<compile_context>
chip_gen: v7x
topology: tpu7x:2x2x1
jax: 0.10.0
libtpu: 0.0.40
codegen_flags: <defaults>
</compile_context>

<pallas_src>
import functools

import jax
import jax.numpy as jnp
from jax.experimental import pallas as pl
from jax.experimental.pallas import tpu as pltpu

IN_FEATURES = 1964
HIDDEN = 72
OUT_FEATURES = 3

# Batch-tile cap: (256 x 1964 f32) x 2 double-buffers ~= 4 MiB of VMEM for x,
# safe on v5e/v6e (128 MiB) and v7x (64 MiB).
MAX_BATCH_TILE = 256


def mlp_kernel(x_ref, w1_ref, b1_ref, w2_ref, b2_ref, o_ref):
    # fc1 (MXU). w1 arrives from HBM in bf16 (halves the dominant DMA) and is
    # widened in-register; accumulation is f32.
    h = jnp.dot(x_ref[...], w1_ref[...].astype(jnp.float32),
                preferred_element_type=jnp.float32)
    # bias + ReLU in f32 (VPU) -- avoids bf16 VPU math, which v5e lacks.
    h = jnp.maximum(h + b1_ref[...], 0.0)
    # TODO(synk): dropout1 (p=0.03) is identity in eval mode; training-mode
    # parity would need pltpu.prng_seed + pltpu.stateful_bernoulli plus the
    # 1/(1-p) inverted-dropout scaling.
    o = jnp.dot(h, w2_ref[...], preferred_element_type=jnp.float32)
    o_ref[...] = (o + b2_ref[...]).astype(o_ref.dtype)


@functools.partial(jax.jit, static_argnames=("batch_tile",))
def net_forward(x, w1, b1, w2, b2, *, batch_tile=None):
    """x: (B, 1964) f32; w1: (1964, 72) bf16/f32; b1: (72,); w2: (72, 3); b2: (3,).
    Returns (B, 3) f32. Weights are stored (in_features, out_features), so the
    kernel computes x @ W + b, matching PyTorch's x @ W.T + b."""
    B, K = x.shape
    assert K == IN_FEATURES

    if batch_tile is None:
        batch_tile = B if B <= MAX_BATCH_TILE else MAX_BATCH_TILE
    tb = batch_tile
    grid = (pl.cdiv(B, tb),)

    # Biases as (1, N) rows so they broadcast cleanly over the batch tile.
    b1r = b1.reshape(1, HIDDEN).astype(jnp.float32)
    b2r = b2.reshape(1, OUT_FEATURES).astype(jnp.float32)

    cost = pl.CostEstimate(
        flops=2 * B * IN_FEATURES * HIDDEN + 2 * B * HIDDEN * OUT_FEATURES,
        transcendentals=0,
        bytes_accessed=(x.size * x.dtype.itemsize
                        + w1.size * w1.dtype.itemsize
                        + b1r.size * 4
                        + w2.size * w2.dtype.itemsize
                        + b2r.size * 4
                        + B * OUT_FEATURES * 4),
    )

    return pl.pallas_call(
        mlp_kernel,
        out_shape=jax.ShapeDtypeStruct((B, OUT_FEATURES), jnp.float32),
        grid_spec=pltpu.PrefetchScalarGridSpec(
            num_scalar_prefetch=0,
            grid=grid,
            in_specs=[
                pl.BlockSpec((tb, IN_FEATURES), lambda i: (i, 0)),       # x tile
                pl.BlockSpec((IN_FEATURES, HIDDEN), lambda i: (0, 0)),   # w1 (VMEM-resident)
                pl.BlockSpec((1, HIDDEN), lambda i: (0, 0)),             # b1
                pl.BlockSpec((HIDDEN, OUT_FEATURES), lambda i: (0, 0)),  # w2
                pl.BlockSpec((1, OUT_FEATURES), lambda i: (0, 0)),       # b2
            ],
            out_specs=pl.BlockSpec((tb, OUT_FEATURES), lambda i: (i, 0)),
        ),
        compiler_params=pltpu.CompilerParams(
            # Batch tiles are independent -> megacore-shardable on v7x.
            dimension_semantics=("parallel",),
        ),
        cost_estimate=cost,
    )(x, w1, b1r, w2, b2r)


def init_params(key):
    """PyTorch nn.Linear default init: U(-1/sqrt(fan_in), 1/sqrt(fan_in))."""
    k1, k2, k3, k4 = jax.random.split(key, 4)
    bound1 = 1.0 / jnp.sqrt(IN_FEATURES)
    bound2 = 1.0 / jnp.sqrt(HIDDEN)
    w1 = jax.random.uniform(k1, (IN_FEATURES, HIDDEN), jnp.float32, -bound1, bound1)
    b1 = jax.random.uniform(k2, (HIDDEN,), jnp.float32, -bound1, bound1)
    w2 = jax.random.uniform(k3, (HIDDEN, OUT_FEATURES), jnp.float32, -bound2, bound2)
    b2 = jax.random.uniform(k4, (OUT_FEATURES,), jnp.float32, -bound2, bound2)
    return w1, b1, w2, b2


if __name__ == "__main__":
    key = jax.random.PRNGKey(0)
    kx1, kx2, kp = jax.random.split(key, 3)

    w1, b1, w2, b2 = init_params(kp)
    # Stream fc1 weights in bf16 (done once at init, not per call).
    w1_bf16 = w1.astype(jnp.bfloat16)
    w1_eff = w1_bf16.astype(jnp.float32)  # effective weights the kernel uses

    def reference(x):
        return jnp.maximum(x @ w1_eff + b1, 0.0) @ w2 + b2

    # Case 1: small batch, single grid step (block == full array dims).
    B1 = 16
    x1 = jax.random.normal(kx1, (B1, IN_FEATURES), jnp.float32)
    out1 = jax.block_until_ready(net_forward(x1, w1_bf16, b1, w2, b2))
    assert out1.shape == (B1, OUT_FEATURES)
    assert jnp.allclose(out1, reference(x1), atol=1e-3, rtol=1e-3)

    # Case 2: exercise the multi-step batch grid (weights stay VMEM-resident,
    # x/out tiles double-buffered, axis marked "parallel" for megacore).
    B2 = 40
    x2 = jax.random.normal(kx2, (B2, IN_FEATURES), jnp.float32)
    out2 = jax.block_until_ready(
        net_forward(x2, w1_bf16, b1, w2, b2, batch_tile=8))
    assert out2.shape == (B2, OUT_FEATURES)
    assert jnp.allclose(out2, reference(x2), atol=1e-3, rtol=1e-3)

    print("KERNEL_OK")
</pallas_src>

<mosaic_0001>
module attributes {stable_mosaic.version = 11 : i64} {
  func.func @mlp_kernel(%arg0: i32, %arg1: memref<16x1964xf32, #tpu.memory_space<vmem>>, %arg2: memref<1964x72xbf16, #tpu.memory_space<vmem>>, %arg3: memref<1x72xf32, #tpu.memory_space<vmem>>, %arg4: memref<72x3xf32, #tpu.memory_space<vmem>>, %arg5: memref<1x3xf32, #tpu.memory_space<vmem>>, %arg6: memref<16x3xf32, #tpu.memory_space<vmem>>) attributes {dimension_semantics = [#tpu.dimension_semantics<parallel>], iteration_bounds = array<i64: 1>, scalar_prefetch = 0 : i64, scratch_operands = 0 : i64, tpu.core_type = #tpu.core_type<tc>, window_params = [{transform_indices = @transform_0, window_bounds = array<i64: 16, 1964>}, {pipeline_mode = #tpu.pipeline_mode<synchronous>, transform_indices = @transform_1, window_bounds = array<i64: 1964, 72>}, {pipeline_mode = #tpu.pipeline_mode<synchronous>, transform_indices = @transform_2, window_bounds = array<i64: 1, 72>}, {pipeline_mode = #tpu.pipeline_mode<synchronous>, transform_indices = @transform_3, window_bounds = array<i64: 72, 3>}, {pipeline_mode = #tpu.pipeline_mode<synchronous>, transform_indices = @transform_4, window_bounds = array<i64: 1, 3>}, {transform_indices = @transform_5, window_bounds = array<i64: 16, 3>}]} {
    %c0 = arith.constant 0 : index
    %c0_0 = arith.constant 0 : index
    %0 = vector.load %arg1[%c0, %c0_0] : memref<16x1964xf32, #tpu.memory_space<vmem>>, vector<16x1964xf32>
    %c0_1 = arith.constant 0 : index
    %c0_2 = arith.constant 0 : index
    %1 = vector.load %arg2[%c0_1, %c0_2] : memref<1964x72xbf16, #tpu.memory_space<vmem>>, vector<1964x72xbf16>
    %2 = arith.extf %1 : vector<1964x72xbf16> to vector<1964x72xf32>
    %cst = arith.constant dense<0.000000e+00> : vector<16x72xf32>
    %3 = tpu.matmul %0, %2, %cst {dimension_numbers = #tpu.dot_dimension_numbers<[1], [0], [0], [1], [0, 0, 1, 1], [], []>} : vector<16x1964xf32>, vector<1964x72xf32>, vector<16x72xf32> -> vector<16x72xf32>
    %c0_3 = arith.constant 0 : index
    %c0_4 = arith.constant 0 : index
    %4 = vector.load %arg3[%c0_3, %c0_4] : memref<1x72xf32, #tpu.memory_space<vmem>>, vector<1x72xf32>
    %5 = vector.broadcast %4 : vector<1x72xf32> to vector<16x72xf32>
    %6 = arith.addf %3, %5 : vector<16x72xf32>
    %cst_5 = arith.constant 0.000000e+00 : f32
    %7 = vector.broadcast %cst_5 : f32 to vector<16x72xf32>
    %8 = arith.maximumf %6, %7 : vector<16x72xf32>
    %c0_6 = arith.constant 0 : index
    %c0_7 = arith.constant 0 : index
    %9 = vector.load %arg4[%c0_6, %c0_7] : memref<72x3xf32, #tpu.memory_space<vmem>>, vector<72x3xf32>
    %cst_8 = arith.constant dense<0.000000e+00> : vector<16x3xf32>
    %10 = tpu.matmul %8, %9, %cst_8 {dimension_numbers = #tpu.dot_dimension_numbers<[1], [0], [0], [1], [0, 0, 1, 1], [], []>} : vector<16x72xf32>, vector<72x3xf32>, vector<16x3xf32> -> vector<16x3xf32>
    %c0_9 = arith.constant 0 : index
    %c0_10 = arith.constant 0 : index
    %11 = vector.load %arg5[%c0_9, %c0_10] : memref<1x3xf32, #tpu.memory_space<vmem>>, vector<1x3xf32>
    %12 = vector.broadcast %11 : vector<1x3xf32> to vector<16x3xf32>
    %13 = arith.addf %10, %12 : vector<16x3xf32>
    %c0_11 = arith.constant 0 : index
    %c0_12 = arith.constant 0 : index
    %14 = vector.load %arg6[%c0_11, %c0_12] : memref<16x3xf32, #tpu.memory_space<vmem>>, vector<16x3xf32>
    tpu.vector_store %arg6[%c0_11, %c0_12], %13 {strides = array<i32>} : memref<16x3xf32, #tpu.memory_space<vmem>>, vector<16x3xf32>,
    return
  }
  func.func @transform_0(%arg0: i32) -> (i32, i32) {
    %c0_i32 = arith.constant 0 : i32
    %c0_i32_0 = arith.constant 0 : i32
    return %arg0, %c0_i32 : i32, i32
  }
  func.func @transform_1(%arg0: i32) -> (i32, i32) {
    %c0_i32 = arith.constant 0 : i32
    %c0_i32_0 = arith.constant 0 : i32
    %c0_i32_1 = arith.constant 0 : i32
    return %c0_i32, %c0_i32_0 : i32, i32
  }
  func.func @transform_2(%arg0: i32) -> (i32, i32) {
    %c0_i32 = arith.constant 0 : i32
    %c0_i32_0 = arith.constant 0 : i32
    %c0_i32_1 = arith.constant 0 : i32
    return %c0_i32, %c0_i32_0 : i32, i32
  }
  func.func @transform_3(%arg0: i32) -> (i32, i32) {
    %c0_i32 = arith.constant 0 : i32
    %c0_i32_0 = arith.constant 0 : i32
    %c0_i32_1 = arith.constant 0 : i32
    return %c0_i32, %c0_i32_0 : i32, i32
  }
  func.func @transform_4(%arg0: i32) -> (i32, i32) {
    %c0_i32 = arith.constant 0 : i32
    %c0_i32_0 = arith.constant 0 : i32
    %c0_i32_1 = arith.constant 0 : i32
    return %c0_i32, %c0_i32_0 : i32, i32
  }
  func.func @transform_5(%arg0: i32) -> (i32, i32) {
    %c0_i32 = arith.constant 0 : i32
    %c0_i32_0 = arith.constant 0 : i32
    return %arg0, %c0_i32 : i32, i32
  }
}

</mosaic_0001>

<bundles_post_ra>
// kernel: net_forward.1
= control target key start
LH: loop header
LB: loop body
LE: loop exit
PB: predicated region body
PF: predicated region fallthrough
CT: control target
= control target key end

     0   :  { %vm551_vm0 = vcmask 359424   ;;  %vm558_vm1 = vcmask 1043456   ;;  %vm2462_vm2 = vmmov 1   ;;  %vm1180_vm4 = vcmask 588800   ;;  %s3010_s1 = inlined_call_operand.vmem [shape: bf16[1964,72], index: 1, kind: input, shape index: {}]   ;;  %s3011_s0 = inlined_call_operand.vmem [shape: f32[16,1964], index: 0, kind: input, shape index: {}]   ;;  %s3012_s3 = inlined_call_operand.vmem [shape: f32[72,3], index: 3, kind: input, shape index: {}]   ;;  %s3013_s2 = inlined_call_operand.vmem [shape: f32[1,72], index: 2, kind: input, shape index: {}]   ;;  %s3014_s4 = inlined_call_operand.vmem [shape: f32[1,3], index: 4, kind: input, shape index: {}]   ;;  %s3015_s5 = inlined_call_operand.vmem [shape: f32[16,3], index: 5, kind: output, shape index: {}]  }
   0x1   :  { %v1771_v0 = vld [vmem:[%s3010_s1 + $0x40] sm:$0xff]   ;;  %v1772_v4 = vld [vmem:[%s3010_s1 + $0x48] sm:$0xff]   ;;  %v1773_v8 = vld [vmem:[%s3010_s1 + $0x50] sm:$0xff]   ;;  %vm1262_vm5 = vcmask 23552  }
   0x2   :  { %v1787_v1 = vld [vmem:[%s3010_s1 + $0xc0] sm:$0xff]   ;;  %2184 = vmatprep.subr.bf16.mxu0 %v1771_v0  ;;  %v1788_v5 = vld [vmem:[%s3010_s1 + $0xc8] sm:$0xff]   ;;  %v1789_v9 = vld [vmem:[%s3010_s1 + $0xd0] sm:$0xff]  }
   0x3   :  { %v1277_v2 = vld [vmem:[%s3010_s1] sm:$0xff]   ;;  %2216 = vmatprep.subr.bf16.mxu1 %v1787_v1  ;;  %v1764_v6 = vld [vmem:[%s3010_s1 + $0x8] sm:$0xff]   ;;  %v1765_v10 = vld [vmem:[%s3010_s1 + $0x10] sm:$0xff]  }
   0x4   :  { %v1779_v3 = vld [vmem:[%s3010_s1 + $0x80] sm:$0xff]   ;;  %2186 = vmatpush3.bf16.msra.mxu0 %v1277_v2  ;;  %v1780_v7 = vld [vmem:[%s3010_s1 + $0x88] sm:$0xff]   ;;  %v1781_v11 = vld [vmem:[%s3010_s1 + $0x90] sm:$0xff]  }
   0x5   :  { %2218 = vmatpush3.bf16.msra.mxu1 %v1779_v3  ;;  %2188 = vmatprep.subr.bf16.mxu0 %v1772_v4  ;;  %v1774_v12 = vld [vmem:[%s3010_s1 + $0x58] sm:$0xff]   ;;  %v21_v14 = vld [vmem:[%s3011_s0 + $0x8] sm:$0xff]  ;;  %v1775_v18 = vld [vmem:[%s3010_s1 + $0x60] sm:$0xff]  }
   0x6   :  { %2220 = vmatprep.subr.bf16.mxu1 %v1788_v5  ;;  %v1790_v13 = vld [vmem:[%s3010_s1 + $0xd8] sm:$0xff]   ;;  %v1791_v19 = vld [vmem:[%s3010_s1 + $0xe0] sm:$0xff]   ;;  %626 = vmatprep.mubr.f32.mxu0 %v21_v14  ;;  %v1776_v22 = vld [vmem:[%s3010_s1 + $0x68] sm:$0xff]  }
   0x7   :  { %v1766_v15 = vld [vmem:[%s3010_s1 + $0x18] sm:$0xff]   ;;  %v1767_v20 = vld [vmem:[%s3010_s1 + $0x20] sm:$0xff]   ;;  %v1792_v23 = vld [vmem:[%s3010_s1 + $0xe8] sm:$0xff]  }
   0x8   :  { %2190 = vmatpush3.bf16.msra.mxu0 %v1764_v6  ;;  %v1782_v16 = vld [vmem:[%s3010_s1 + $0x98] sm:$0xff]   ;;  %v1783_v21 = vld [vmem:[%s3010_s1 + $0xa0] sm:$0xff]   ;;  %v1768_v24 = vld [vmem:[%s3010_s1 + $0x28] sm:$0xff]  }
   0x9   :  { %2222 = vmatpush3.bf16.msra.mxu1 %v1780_v7  ;;  %2192 = vmatprep.subr.bf16.mxu0 %v1773_v8  ;;  %v23_v17 = vld [vmem:[%s3011_s0 + $0x18] sm:$0xff]  ;;  %v1784_v25 = vld [vmem:[%s3010_s1 + $0xa8] sm:$0xff]   ;;  %v1777_v26 = vld [vmem:[%s3010_s1 + $0x70] sm:$0xff]  }
   0xa   :  { %2224 = vmatprep.subr.bf16.mxu1 %v1789_v9  ;;  %701 = vmatprep.mubr.f32.mxu1 %v23_v17  ;;  %v1793_v27 = vld [vmem:[%s3010_s1 + $0xf0] sm:$0xff]   ;;  %v1778_v30 = vld [vmem:[%s3010_s1 + $0x78] sm:$0xff]   ;;  %v1803_v34 = vld [vmem:[%s3010_s1 + $0x140] sm:$0xff]  }
   0xb   :  { %v1769_v28 = vld [vmem:[%s3010_s1 + $0x30] sm:$0xff]   ;;  %v1794_v31 = vld [vmem:[%s3010_s1 + $0xf8] sm:$0xff]   ;;  %v1819_v35 = vld [vmem:[%s3010_s1 + $0x1c0] sm:$0xff]  }
   0xc   :  { %2194 = vmatpush3.bf16.msra.mxu0 %v1765_v10  ;;  %v1785_v29 = vld [vmem:[%s3010_s1 + $0xb0] sm:$0xff]   ;;  %v1770_v32 = vld [vmem:[%s3010_s1 + $0x38] sm:$0xff]   ;;  %v20_v36 = vld [vmem:[%s3011_s0] sm:$0xff] }
   0xd   :  { %2226 = vmatpush3.bf16.msra.mxu1 %v1781_v11  ;;  %2196 = vmatprep.subr.bf16.mxu0 %v1774_v12  ;;  %v1786_v33 = vld [vmem:[%s3010_s1 + $0xb8] sm:$0xff]   ;;  %v22_v37 = vld [vmem:[%s3011_s0 + $0x10] sm:$0xff]  ;;  %v1795_v38 = vld [vmem:[%s3010_s1 + $0x100] sm:$0xff]  }
   0xe   :  { %2228 = vmatprep.subr.bf16.mxu1 %v1790_v13  ;;  %v1811_v39 = vld [vmem:[%s3010_s1 + $0x180] sm:$0xff]   ;;  %v1804_v40 = vld [vmem:[%s3010_s1 + $0x148] sm:$0xff]   ;;  %v39_v43 = vld [vmem:[%s3011_s0 + $0x98] sm:$0xff] }
   0xf   :  { %v1820_v41 = vld [vmem:[%s3010_s1 + $0x1c8] sm:$0xff]   ;;  %v36_v44 = vld [vmem:[%s3011_s0 + $0x80] sm:$0xff]  ;;  %v38_v45 = vld [vmem:[%s3011_s0 + $0x90] sm:$0xff] }
  0x10   :  { %2198 = vmatpush3.bf16.msra.mxu0 %v1766_v15  ;;  %v37_v42 = vld [vmem:[%s3011_s0 + $0x88] sm:$0xff]  ;;  %v1805_v48 = vld [vmem:[%s3010_s1 + $0x150] sm:$0xff]   ;;  %v27_v51 = vld [vmem:[%s3011_s0 + $0x38] sm:$0xff] }
  0x11   :  { %2230 = vmatpush3.bf16.msra.mxu1 %v1782_v16  ;;  %2200 = vmatprep.subr.bf16.mxu0 %v1775_v18  ;;  %v1796_v46 = vld [vmem:[%s3010_s1 + $0x108] sm:$0xff]   ;;  %v1821_v49 = vld [vmem:[%s3010_s1 + $0x1d0] sm:$0xff]   ;;  %v1806_v54 = vld [vmem:[%s3010_s1 + $0x158] sm:$0xff]  }
  0x12   :  { %2232 = vmatprep.subr.bf16.mxu1 %v1791_v19  ;;  %v1812_v47 = vld [vmem:[%s3010_s1 + $0x188] sm:$0xff]   ;;  %v1797_v52 = vld [vmem:[%s3010_s1 + $0x110] sm:$0xff]   ;;  %v1822_v55 = vld [vmem:[%s3010_s1 + $0x1d8] sm:$0xff]  }
  0x13   :  { %v25_v50 = vld [vmem:[%s3011_s0 + $0x28] sm:$0xff]  ;;  %v1813_v53 = vld [vmem:[%s3010_s1 + $0x190] sm:$0xff]   ;;  %v1798_v56 = vld [vmem:[%s3010_s1 + $0x118] sm:$0xff]  }
  0x14   :  { %2202 = vmatpush3.bf16.msra.mxu0 %v1767_v20  ;;  %v1814_v57 = vld [vmem:[%s3010_s1 + $0x198] sm:$0xff]   ;;  %v1807_v58 = vld [vmem:[%s3010_s1 + $0x160] sm:$0xff]   ;;  %v1808_v62 = vld [vmem:[%s3010_s1 + $0x168] sm:$0xff]  }
  0x15   :  { %2234 = vmatpush3.bf16.msra.mxu1 %v1783_v21  ;;  %2204 = vmatprep.subr.bf16.mxu0 %v1776_v22  ;;  %v1823_v59 = vld [vmem:[%s3010_s1 + $0x1e0] sm:$0xff]   ;;  %v1824_v63 = vld [vmem:[%s3010_s1 + $0x1e8] sm:$0xff]   ;;  %v1809_v2 = vld [vmem:[%s3010_s1 + $0x170] sm:$0xff]  }
  0x16   :  { %2236 = vmatprep.subr.bf16.mxu1 %v1792_v23  ;;  %v1799_v60 = vld [vmem:[%s3010_s1 + $0x120] sm:$0xff]   ;;  %v1800_v0 = vld [vmem:[%s3010_s1 + $0x128] sm:$0xff]   ;;  %v1825_v3 = vld [vmem:[%s3010_s1 + $0x1f0] sm:$0xff]  }
  0x17   :  { %v1815_v61 = vld [vmem:[%s3010_s1 + $0x1a0] sm:$0xff]   ;;  %v1816_v1 = vld [vmem:[%s3010_s1 + $0x1a8] sm:$0xff]   ;;  %v1801_v4 = vld [vmem:[%s3010_s1 + $0x130] sm:$0xff]  }
  0x18   :  { %2206 = vmatpush3.bf16.msra.mxu0 %v1768_v24  ;;  %v1817_v5 = vld [vmem:[%s3010_s1 + $0x1b0] sm:$0xff]   ;;  %v1810_v6 = vld [vmem:[%s3010_s1 + $0x178] sm:$0xff]   ;;  %v1835_v10 = vld [vmem:[%s3010_s1 + $0x240] sm:$0xff]  }
  0x19   :  { %2238 = vmatpush3.bf16.msra.mxu1 %v1784_v25  ;;  %2208 = vmatprep.subr.bf16.mxu0 %v1777_v26  ;;  %v1826_v7 = vld [vmem:[%s3010_s1 + $0x1f8] sm:$0xff]   ;;  %v1851_v11 = vld [vmem:[%s3010_s1 + $0x2c0] sm:$0xff]   ;;  %v26_v13 = vld [vmem:[%s3011_s0 + $0x30] sm:$0xff] }
  0x1a   :  { %2240 = vmatprep.subr.bf16.mxu1 %v1793_v27  ;;  %v1802_v8 = vld [vmem:[%s3010_s1 + $0x138] sm:$0xff]   ;;  %v24_v12 = vld [vmem:[%s3011_s0 + $0x20] sm:$0xff]  ;;  %v41_v16 = vld [vmem:[%s3011_s0 + $0xa8] sm:$0xff] }
  0x1b   :  { %v1818_v9 = vld [vmem:[%s3010_s1 + $0x1b8] sm:$0xff]   ;;  %v1827_v14 = vld [vmem:[%s3010_s1 + $0x200] sm:$0xff]   ;;  %v1836_v17 = vld [vmem:[%s3010_s1 + $0x248] sm:$0xff]  }
  0x1c   :  { %2210 = vmatpush3.bf16.msra.mxu0 %v1769_v28  ;;  %v1843_v15 = vld [vmem:[%s3010_s1 + $0x280] sm:$0xff]   ;;  %v1852_v18 = vld [vmem:[%s3010_s1 + $0x2c8] sm:$0xff]   ;;  %v43_v19 = vld [vmem:[%s3011_s0 + $0xb8] sm:$0xff] }
  0x1d   :  { %2242 = vmatpush3.bf16.msra.mxu1 %v1785_v29  ;;  %2212 = vmatprep.subr.bf16.mxu0 %v1778_v30  ;;  %v40_v20 = vld [vmem:[%s3011_s0 + $0xa0] sm:$0xff]  ;;  %v42_v21 = vld [vmem:[%s3011_s0 + $0xb0] sm:$0xff]  ;;  %v1828_v22 = vld [vmem:[%s3010_s1 + $0x208] sm:$0xff]  }
  0x1e   :  { %2244 = vmatprep.subr.bf16.mxu1 %v1794_v31  ;;  %v1844_v23 = vld [vmem:[%s3010_s1 + $0x288] sm:$0xff]   ;;  %v1837_v24 = vld [vmem:[%s3010_s1 + $0x250] sm:$0xff]   ;;  %v31_v27 = vld [vmem:[%s3011_s0 + $0x58] sm:$0xff] }
  0x1f   :  { %v1853_v25 = vld [vmem:[%s3010_s1 + $0x2d0] sm:$0xff]   ;;  %v29_v26 = vld [vmem:[%s3011_s0 + $0x48] sm:$0xff]  ;;  %v1838_v30 = vld [vmem:[%s3010_s1 + $0x258] sm:$0xff]  }
  0x20   :  { %2214 = vmatpush3.bf16.msra.mxu0 %v1770_v32  ;;  %v1829_v28 = vld [vmem:[%s3010_s1 + $0x210] sm:$0xff]   ;;  %v1854_v31 = vld [vmem:[%s3010_s1 + $0x2d8] sm:$0xff]   ;;  %vm2439_vm3 = vmpackc.low %vm558_vm1, %vm2462_vm2 }
  0x21   :  { %2246 = vmatpush3.bf16.msra.mxu1 %v1786_v33  ;;  %2248 = vmatprep.subr.bf16.mxu0 %v1803_v34  ;;  %v1845_v29 = vld [vmem:[%s3010_s1 + $0x290] sm:$0xff]   ;;  %v1830_v32 = vld [vmem:[%s3010_s1 + $0x218] sm:$0xff]   ;;  %v1839_v34 = vld [vmem:[%s3010_s1 + $0x260] sm:$0xff]  }
  0x22   :  { %2280 = vmatprep.subr.bf16.mxu1 %v1819_v35  ;;  %v1846_v33 = vld [vmem:[%s3010_s1 + $0x298] sm:$0xff]   ;;  %v1855_v35 = vld [vmem:[%s3010_s1 + $0x2e0] sm:$0xff]  }
  0x23   :  { %627 = vmatmul.mubr.f32.vlgmr.msra.gmra.mrb[0].mxu0 %v20_v36  ;;  %v1831_v36 = vld [vmem:[%s3010_s1 + $0x220] sm:$0xff]  }
  0x24   :  { %702 = vmatmul.mubr.f32.vlgmr.msra.gmra.mrb[0].mxu1 %v22_v37  ;;  %2250 = vmatpush3.bf16.msra.mxu0 %v1795_v38  ;;  %v1847_v37 = vld [vmem:[%s3010_s1 + $0x2a0] sm:$0xff]   ;;  %v1840_v38 = vld [vmem:[%s3010_s1 + $0x268] sm:$0xff]  }
  0x25   :  { %2282 = vmatpush3.bf16.msra.mxu1 %v1811_v39  ;;  %2252 = vmatprep.subr.bf16.mxu0 %v1804_v40  ;;  %v1856_v39 = vld [vmem:[%s3010_s1 + $0x2e8] sm:$0xff]  }
  0x26   :  { %2284 = vmatprep.subr.bf16.mxu1 %v1820_v41  ;;  %631 = vmatprep.mubr.f32.mxu0 %v37_v42  ;;  %v1832_v40 = vld [vmem:[%s3010_s1 + $0x228] sm:$0xff]   ;;  %v1841_v42 = vld [vmem:[%s3010_s1 + $0x270] sm:$0xff]  }
  0x27   :  { %706 = vmatprep.mubr.f32.mxu1 %v39_v43  ;;  %632 = vmatmul.mubr.f32.gmra.mrb[2].mxu0 %v36_v44  ;;  %v1848_v41 = vld [vmem:[%s3010_s1 + $0x2a8] sm:$0xff]   ;;  %v1857_v43 = vld [vmem:[%s3010_s1 + $0x2f0] sm:$0xff]  }
  0x28   :  { %707 = vmatmul.mubr.f32.gmra.mrb[2].mxu1 %v38_v45  ;;  %2254 = vmatpush3.bf16.msra.mxu0 %v1796_v46  ;;  %v1833_v44 = vld [vmem:[%s3010_s1 + $0x230] sm:$0xff]   ;;  %v1842_v46 = vld [vmem:[%s3010_s1 + $0x278] sm:$0xff]  }
  0x29   :  { %2286 = vmatpush3.bf16.msra.mxu1 %v1812_v47  ;;  %2256 = vmatprep.subr.bf16.mxu0 %v1805_v48  ;;  %v1849_v45 = vld [vmem:[%s3010_s1 + $0x2b0] sm:$0xff]   ;;  %v1858_v47 = vld [vmem:[%s3010_s1 + $0x2f8] sm:$0xff]  }
  0x2a   :  { %2288 = vmatprep.subr.bf16.mxu1 %v1821_v49  ;;  %776 = vmatprep.mubr.f32.mxu0 %v25_v50  ;;  %v1834_v48 = vld [vmem:[%s3010_s1 + $0x238] sm:$0xff]   ;;  %v1867_v50 = vld [vmem:[%s3010_s1 + $0x340] sm:$0xff]  }
  0x2b   :  { %851 = vmatprep.mubr.f32.mxu1 %v27_v51  ;;  %v1850_v49 = vld [vmem:[%s3010_s1 + $0x2b8] sm:$0xff]   ;;  %v28_v51 = vld [vmem:[%s3011_s0 + $0x40] sm:$0xff] }
  0x2c   :  { %2258 = vmatpush3.bf16.msra.mxu0 %v1797_v52  ;;  %v30_v52 = vld [vmem:[%s3011_s0 + $0x50] sm:$0xff] }
  0x2d   :  { %2290 = vmatpush3.bf16.msra.mxu1 %v1813_v53  ;;  %2260 = vmatprep.subr.bf16.mxu0 %v1806_v54  ;;  %v2461_v53 = vmov 0.0|0.0   ;;  %v1859_v54 = vld [vmem:[%s3010_s1 + $0x300] sm:$0xff]  }
  0x2e   :  { %2292 = vmatprep.subr.bf16.mxu1 %v1822_v55  ;;  %v1875_v55 = vld [vmem:[%s3010_s1 + $0x380] sm:$0xff]  }
  0x30   :  { %2262 = vmatpush3.bf16.msra.mxu0 %v1798_v56  ;;  %v45_v56 = vld [vmem:[%s3011_s0 + $0xc8] sm:$0xff] }
  0x31   :  { %2294 = vmatpush3.bf16.msra.mxu1 %v1814_v57  ;;  %2264 = vmatprep.subr.bf16.mxu0 %v1807_v58  ;;  %v1868_v57 = vld [vmem:[%s3010_s1 + $0x348] sm:$0xff]   ;;  %v47_v58 = vld [vmem:[%s3011_s0 + $0xd8] sm:$0xff] }
  0x32   :  { %2296 = vmatprep.subr.bf16.mxu1 %v1823_v59  ;;  %v44_v59 = vld [vmem:[%s3011_s0 + $0xc0] sm:$0xff] }
  0x34   :  { %2266 = vmatpush3.bf16.msra.mxu0 %v1799_v60  ;;  %v46_v60 = vld [vmem:[%s3011_s0 + $0xd0] sm:$0xff] }
  0x35   :  { %2298 = vmatpush3.bf16.msra.mxu1 %v1815_v61  ;;  %2268 = vmatprep.subr.bf16.mxu0 %v1808_v62  ;;  %v1860_v61 = vld [vmem:[%s3010_s1 + $0x308] sm:$0xff]  }
  0x36   :  { %2300 = vmatprep.subr.bf16.mxu1 %v1824_v63  ;;  %v1876_v62 = vld [vmem:[%s3010_s1 + $0x388] sm:$0xff]   ;;  %v1869_v63 = vld [vmem:[%s3010_s1 + $0x350] sm:$0xff]  }
  0x38   :  { %2270 = vmatpush3.bf16.msra.mxu0 %v1800_v0  ;;  %v33_v0 = vld [vmem:[%s3011_s0 + $0x68] sm:$0xff] }
  0x39   :  { %2302 = vmatpush3.bf16.msra.mxu1 %v1816_v1  ;;  %2272 = vmatprep.subr.bf16.mxu0 %v1809_v2  ;;  %v35_v1 = vld [vmem:[%s3011_s0 + $0x78] sm:$0xff]  ;;  %v1861_v2 = vld [vmem:[%s3010_s1 + $0x310] sm:$0xff]  }
  0x3a   :  { %2304 = vmatprep.subr.bf16.mxu1 %v1825_v3  ;;  %v1877_v3 = vld [vmem:[%s3010_s1 + $0x390] sm:$0xff]  }
  0x3c   :  { %2274 = vmatpush3.bf16.msra.mxu0 %v1801_v4  ;;  %v1870_v4 = vld [vmem:[%s3010_s1 + $0x358] sm:$0xff]  }
  0x3d   :  { %2306 = vmatpush3.bf16.msra.mxu1 %v1817_v5  ;;  %2276 = vmatprep.subr.bf16.mxu0 %v1810_v6  ;;  %v1862_v5 = vld [vmem:[%s3010_s1 + $0x318] sm:$0xff]  }
  0x3e   :  { %2308 = vmatprep.subr.bf16.mxu1 %v1826_v7  ;;  %v1878_v6 = vld [vmem:[%s3010_s1 + $0x398] sm:$0xff]   ;;  %v1871_v7 = vld [vmem:[%s3010_s1 + $0x360] sm:$0xff]  }
  0x40   :  { %2278 = vmatpush3.bf16.msra.mxu0 %v1802_v8  ;;  %v1863_v8 = vld [vmem:[%s3010_s1 + $0x320] sm:$0xff]  }
  0x41   :  { %2310 = vmatpush3.bf16.msra.mxu1 %v1818_v9  ;;  %2312 = vmatprep.subr.bf16.mxu0 %v1835_v10  ;;  %v1879_v9 = vld [vmem:[%s3010_s1 + $0x3a0] sm:$0xff]   ;;  %v1872_v10 = vld [vmem:[%s3010_s1 + $0x368] sm:$0xff]  }
  0x42   :  { %2344 = vmatprep.subr.bf16.mxu1 %v1851_v11  ;;  %v1864_v11 = vld [vmem:[%s3010_s1 + $0x328] sm:$0xff]  }
  0x43   :  { %777 = vmatmul.mubr.f32.vlgmr.msra.gmra.mrb[4].mxu0 %v24_v12  ;;  %v1880_v12 = vld [vmem:[%s3010_s1 + $0x3a8] sm:$0xff]  }
  0x44   :  { %852 = vmatmul.mubr.f32.vlgmr.msra.gmra.mrb[4].mxu1 %v26_v13  ;;  %2314 = vmatpush3.bf16.msra.mxu0 %v1827_v14  ;;  %v1873_v13 = vld [vmem:[%s3010_s1 + $0x370] sm:$0xff]  }
  0x45   :  { %2346 = vmatpush3.bf16.msra.mxu1 %v1843_v15  ;;  %781 = vmatprep.mubr.f32.mxu0 %v41_v16  ;;  %v1865_v14 = vld [vmem:[%s3010_s1 + $0x330] sm:$0xff]   ;;  %v1874_v16 = vld [vmem:[%s3010_s1 + $0x378] sm:$0xff]  }
  0x46   :  { %2316 = vmatprep.subr.bf16.mxu0 %v1836_v17  ;;  %2348 = vmatprep.subr.bf16.mxu1 %v1852_v18  ;;  %v1881_v15 = vld [vmem:[%s3010_s1 + $0x3b0] sm:$0xff]   ;;  %v1866_v17 = vld [vmem:[%s3010_s1 + $0x338] sm:$0xff]  }
  0x47   :  { %856 = vmatprep.mubr.f32.mxu1 %v43_v19  ;;  %782 = vmatmul.mubr.f32.gmra.mrb[6].mxu0 %v40_v20  ;;  %v1882_v18 = vld [vmem:[%s3010_s1 + $0x3b8] sm:$0xff]   ;;  %v32_v19 = vld [vmem:[%s3011_s0 + $0x60] sm:$0xff] }
  0x48   :  { %857 = vmatmul.mubr.f32.gmra.mrb[6].mxu1 %v42_v21  ;;  %2318 = vmatpush3.bf16.msra.mxu0 %v1828_v22  ;;  %v1883_v20 = vld [vmem:[%s3010_s1 + $0x3c0] sm:$0xff]   ;;  %v49_v21 = vld [vmem:[%s3011_s0 + $0xe8] sm:$0xff] }
  0x49   :  { %2350 = vmatpush3.bf16.msra.mxu1 %v1844_v23  ;;  %2320 = vmatprep.subr.bf16.mxu0 %v1837_v24  ;;  %v48_v22 = vld [vmem:[%s3011_s0 + $0xe0] sm:$0xff]  ;;  %v1884_v23 = vld [vmem:[%s3010_s1 + $0x3c8] sm:$0xff]   ;;  %v2460_v24 = vld [vmem:[%s3010_s1 + $0x3d0] sm:$0x3f]  }
  0x4a   :  { %2352 = vmatprep.subr.bf16.mxu1 %v1853_v25  ;;  %926 = vmatprep.mubr.f32.mxu0 %v29_v26  ;;  %v34_v25 = vld [vmem:[%s3011_s0 + $0x70] sm:$0xff]  ;;  %v51_v26 = vld [vmem:[%s3011_s0 + $0xf8] sm:$0xff] }
  0x4b   :  { %1001 = vmatprep.mubr.f32.mxu1 %v31_v27  ;;  %v50_v27 = vld [vmem:[%s3011_s0 + $0xf0] sm:$0xff] }
  0x4c   :  { %2322 = vmatpush3.bf16.msra.mxu0 %v1829_v28  ;;  %v1164_v28 = vld [vmem:[%s3012_s3] sm:$0xff] }
  0x4d   :  { %2354 = vmatpush3.bf16.msra.mxu1 %v1845_v29  ;;  %2324 = vmatprep.subr.bf16.mxu0 %v1838_v30  ;;  %v1165_v29 = vld [vmem:[%s3012_s3 + $0x8] sm:$0xff] }
  0x4e   :  { %2356 = vmatprep.subr.bf16.mxu1 %v1854_v31  ;;  %v2441_v30 = vpack.c.bf16 %v1165_v29, %v1164_v28  ;;  %v1166_v31 = vld [vmem:[%s3012_s3 + $0x10] sm:$0xff] }
  0x50   :  { %2326 = vmatpush3.bf16.msra.mxu0 %v1830_v32  ;;  %v1167_v32 = vld [vmem:[%s3012_s3 + $0x18] sm:$0xff] }
  0x51   :  { %2358 = vmatpush3.bf16.msra.mxu1 %v1846_v33  ;;  %2328 = vmatprep.subr.bf16.mxu0 %v1839_v34  ;;  %v2445_v33 = vpack.c.bf16 %v1167_v32, %v1166_v31  ;;  %v1168_v34 = vld [vmem:[%s3012_s3 + $0x20] sm:$0xff] }
  0x52   :  { %2360 = vmatprep.subr.bf16.mxu1 %v1855_v35  ;;  %v1169_v35 = vld [vmem:[%s3012_s3 + $0x28] sm:$0xff] }
  0x54   :  { %2330 = vmatpush3.bf16.msra.mxu0 %v1831_v36  ;;  %v2449_v36 = vpack.c.bf16 %v1169_v35, %v1168_v34 }
  0x55   :  { %2362 = vmatpush3.bf16.msra.mxu1 %v1847_v37  ;;  %2332 = vmatprep.subr.bf16.mxu0 %v1840_v38  ;;  %v1170_v37 = vld [vmem:[%s3012_s3 + $0x30] sm:$0xff]  ;;  %v1171_v38 = vld [vmem:[%s3012_s3 + $0x38] sm:$0xff] }
  0x56   :  { %2364 = vmatprep.subr.bf16.mxu1 %v1856_v39  ;;  %v2453_v39 = vpack.c.bf16 %v1171_v38, %v1170_v37 }
  0x58   :  { %2334 = vmatpush3.bf16.msra.mxu0 %v1832_v40  ;;  %v1172_v40 = vld [vmem:[%s3012_s3 + $0x40] sm:$0xff] }
  0x59   :  { %2366 = vmatpush3.bf16.msra.mxu1 %v1848_v41  ;;  %2336 = vmatprep.subr.bf16.mxu0 %v1841_v42 }
  0x5a   :  { %2368 = vmatprep.subr.bf16.mxu1 %v1857_v43  ;;  %v1269_v43 = vld [vmem:[%s3013_s2] ss:$0 sm:$0xff] }
  0x5c   :  { %2338 = vmatpush3.bf16.msra.mxu0 %v1833_v44 }
  0x5d   :  { %2370 = vmatpush3.bf16.msra.mxu1 %v1849_v45  ;;  %2340 = vmatprep.subr.bf16.mxu0 %v1842_v46 }
  0x5e   :  { %2372 = vmatprep.subr.bf16.mxu1 %v1858_v47 }
  0x60   :  { %2342 = vmatpush3.bf16.msra.mxu0 %v1834_v48 }
  0x61   :  { %2374 = vmatpush3.bf16.msra.mxu1 %v1850_v49  ;;  %2376 = vmatprep.subr.bf16.mxu0 %v1867_v50 }
  0x62   :  { %2407 = vmatprep.subr.bf16.mxu1 %v2461_v53 }
  0x63   :  { %927 = vmatmul.mubr.f32.vlgmr.msra.gmra.mrb[8].mxu0 %v28_v51 }
  0x64   :  { %1002 = vmatmul.mubr.f32.vlgmr.msra.gmra.mrb[8].mxu1 %v30_v52  ;;  %2378 = vmatpush3.bf16.msra.mxu0 %v1859_v54 }
  0x65   :  { %2409 = vmatpush1.bf16.msra.mxu1 %v1875_v55  ;;  %931 = vmatprep.mubr.f32.mxu0 %v45_v56 }
  0x66   :  { %2380 = vmatprep.subr.bf16.mxu0 %v1868_v57  ;;  %2410 = vmatprep.subr.bf16.mxu1 %v2461_v53 }
  0x67   :  { %1006 = vmatprep.mubr.f32.mxu1 %v47_v58  ;;  %932 = vmatmul.mubr.f32.gmra.mrb[10].mxu0 %v44_v59 }
  0x68   :  { %1007 = vmatmul.mubr.f32.gmra.mrb[10].mxu1 %v46_v60  ;;  %2382 = vmatpush3.bf16.msra.mxu0 %v1860_v61 }
  0x69   :  { %2412 = vmatpush1.bf16.msra.mxu1 %v1876_v62  ;;  %2384 = vmatprep.subr.bf16.mxu0 %v1869_v63 }
  0x6a   :  { %2413 = vmatprep.subr.bf16.mxu1 %v2461_v53  ;;  %1076 = vmatprep.mubr.f32.mxu0 %v33_v0 }
  0x6b   :  { %1271 = vmatprep.mubr.msk.f32.mxu1 %vm551_vm0, %v35_v1 }
  0x6c   :  { %2386 = vmatpush3.bf16.msra.mxu0 %v1861_v2 }
  0x6d   :  { %2415 = vmatpush1.bf16.msra.mxu1 %v1877_v3  ;;  %2388 = vmatprep.subr.bf16.mxu0 %v1870_v4 }
  0x6e   :  { %2416 = vmatprep.subr.bf16.mxu1 %v2461_v53 }
  0x70   :  { %2390 = vmatpush3.bf16.msra.mxu0 %v1862_v5 }
  0x71   :  { %2418 = vmatpush1.bf16.msra.mxu1 %v1878_v6  ;;  %2392 = vmatprep.subr.bf16.mxu0 %v1871_v7 }
  0x72   :  { %2419 = vmatprep.subr.bf16.mxu1 %v2461_v53 }
  0x74   :  { %2394 = vmatpush3.bf16.msra.mxu0 %v1863_v8 }
  0x75   :  { %2421 = vmatpush1.bf16.msra.mxu1 %v1879_v9  ;;  %2396 = vmatprep.subr.bf16.mxu0 %v1872_v10 }
  0x76   :  { %2422 = vmatprep.subr.bf16.mxu1 %v2461_v53 }
  0x78   :  { %2398 = vmatpush3.bf16.msra.mxu0 %v1864_v11 }
  0x79   :  { %2424 = vmatpush1.bf16.msra.mxu1 %v1880_v12  ;;  %2400 = vmatprep.subr.bf16.mxu0 %v1873_v13 }
  0x7a   :  { %2425 = vmatprep.subr.bf16.mxu1 %v2461_v53 }
  0x7c   :  { %2402 = vmatpush3.bf16.msra.mxu0 %v1865_v14 }
  0x7d   :  { %2427 = vmatpush1.bf16.msra.mxu1 %v1881_v15  ;;  %2404 = vmatprep.subr.bf16.mxu0 %v1874_v16 }
  0x7e   :  { %2428 = vmatprep.subr.bf16.mxu1 %v2461_v53 }
  0x80   :  { %2406 = vmatpush3.bf16.msra.mxu0 %v1866_v17 }
  0x81   :  { %2430 = vmatpush1.bf16.msra.mxu1 %v1882_v18  ;;  %2442 = vmatprep.subr.bf16.mxu0 %v2441_v30 }
  0x82   :  { %2431 = vmatprep.subr.bf16.mxu1 %v2461_v53 }
  0x83   :  { %1077 = vmatmul.mubr.f32.vlgmr.msra.gmra.mrb[12].mxu0 %v32_v19 }
  0x84   :  { %1081 = vmatprep.mubr.f32.mxu0 %v49_v21  ;;  %2444 = vmatpush3.bf16.msra.mxu0 %v2441_v30 }
  0x85   :  { %2433 = vmatpush1.bf16.msra.mxu1 %v1883_v20  ;;  %2446 = vmatprep.subr.bf16.mxu0 %v2445_v33 }
  0x86   :  { %2434 = vmatprep.subr.bf16.mxu1 %v2461_v53 }
  0x87   :  { %1082 = vmatmul.mubr.f32.gmra.mrb[14].mxu0 %v48_v22 }
  0x88   :  { %2448 = vmatpush3.bf16.msra.mxu0 %v2445_v33 }
  0x89   :  { %2436 = vmatpush1.bf16.msra.mxu1 %v1884_v23  ;;  %2450 = vmatprep.subr.bf16.mxu0 %v2449_v36 }
  0x8a   :  { %2437 = vmatprep.subr.bf16.mxu1 %v2461_v53 }
  0x8c   :  { %2452 = vmatpush3.bf16.msra.mxu0 %v2449_v36 }
  0x8d   :  { %2440 = vmatpush1.bf16.msk.msra.mxu1 %vm2439_vm3, %v2460_v24  ;;  %2454 = vmatprep.subr.bf16.mxu0 %v2453_v39 }
  0x90   :  { %1152 = vmatmul.mubr.f32.vlgmr.msra.gmra.mrb[12].mxu1 %v34_v25  ;;  %2456 = vmatpush3.bf16.msra.mxu0 %v2453_v39 }
  0x91   :  { %1272 = vmatprep.mubr.msk.f32.mxu1 %vm551_vm0, %v51_v26  ;;  %2178 = vmatprep.subr.mxu0 %v1172_v40 }
  0x94   :  { %1157 = vmatmul.mubr.f32.gmra.mrb[14].mxu1 %v50_v27  ;;  %2179 = vmatpush3.msra.mxu0 %v1172_v40 }
  0xf6   :  { %v1917_v41 = vpop.f32.mrb[0].mxu0 }
  0xf7   :  { %v1955_v42 = vpop.f32.mrb[0].mxu1  ;;  %v1918_v44 = vpop.f32.mrb[1].mxu0 }
  0xf8   :  { %v1956_v45 = vpop.f32.mrb[1].mxu1  ;;  %v1919_v46 = vadd.f32 %v1918_v44, %v1917_v41 }
  0xf9   :  { %v1957_v47 = vadd.f32 %v1956_v45, %v1955_v42  ;;  %v1273_v42 = vld [vmem:[%s3014_s4] ss:$0 sm:$0xff] }
  0xfa   :  { %v629_v48 = vadd.f32 %v1919_v46, %v1269_v43  ;;  %v1920_v49 = vpop.f32.mrb[2].mxu0 }
  0xfb   :  { %v1958_v50 = vpop.f32.mrb[2].mxu1  ;;  %v1921_v51 = vpop.f32.mrb[3].mxu0 }
  0xfc   :  { %v1959_v52 = vpop.f32.mrb[3].mxu1  ;;  %v704_v53 = vadd.f32 %v1957_v47, %v629_v48  ;;  %v1922_v54 = vadd.f32 %v1921_v51, %v1920_v49 }
  0xfd   :  { %v1960_v55 = vadd.f32 %v1959_v52, %v1958_v50 }
  0xfe   :  { %v634_v56 = vadd.f32 %v1922_v54, %v1269_v43 }
 0x100   :  { %v709_v57 = vadd.f32 %v1960_v55, %v634_v56 }
 0x116   :  { %v1993_v58 = vpop.f32.mrb[4].mxu0 }
 0x117   :  { %v2031_v59 = vpop.f32.mrb[4].mxu1  ;;  %v1994_v60 = vpop.f32.mrb[5].mxu0 }
 0x118   :  { %v2032_v61 = vpop.f32.mrb[5].mxu1  ;;  %v1995_v62 = vadd.f32 %v1994_v60, %v1993_v58 }
 0x119   :  { %v2033_v63 = vadd.f32 %v2032_v61, %v2031_v59 }
 0x11a   :  { %v779_v0 = vadd.f32 %v1995_v62, %v704_v53  ;;  %v1996_v1 = vpop.f32.mrb[6].mxu0 }
 0x11b   :  { %v2034_v2 = vpop.f32.mrb[6].mxu1  ;;  %v1997_v3 = vpop.f32.mrb[7].mxu0 }
 0x11c   :  { %v2035_v4 = vpop.f32.mrb[7].mxu1  ;;  %v854_v5 = vadd.f32 %v2033_v63, %v779_v0  ;;  %v1998_v6 = vadd.f32 %v1997_v3, %v1996_v1 }
 0x11d   :  { %v2036_v7 = vadd.f32 %v2035_v4, %v2034_v2 }
 0x11e   :  { %v784_v8 = vadd.f32 %v1998_v6, %v709_v57 }
 0x120   :  { %v859_v9 = vadd.f32 %v2036_v7, %v784_v8 }
 0x136   :  { %v2069_v10 = vpop.f32.mrb[8].mxu0 }
 0x137   :  { %v2107_v11 = vpop.f32.mrb[8].mxu1  ;;  %v2070_v12 = vpop.f32.mrb[9].mxu0 }
 0x138   :  { %v2108_v13 = vpop.f32.mrb[9].mxu1  ;;  %v2071_v14 = vadd.f32 %v2070_v12, %v2069_v10 }
 0x139   :  { %v2109_v15 = vadd.f32 %v2108_v13, %v2107_v11 }
 0x13a   :  { %v929_v16 = vadd.f32 %v2071_v14, %v854_v5  ;;  %v2072_v17 = vpop.f32.mrb[10].mxu0 }
 0x13b   :  { %v2110_v18 = vpop.f32.mrb[10].mxu1  ;;  %v2073_v19 = vpop.f32.mrb[11].mxu0 }
 0x13c   :  { %v2111_v20 = vpop.f32.mrb[11].mxu1  ;;  %v1004_v21 = vadd.f32 %v2109_v15, %v929_v16  ;;  %v2074_v22 = vadd.f32 %v2073_v19, %v2072_v17 }
 0x13d   :  { %v2112_v23 = vadd.f32 %v2111_v20, %v2110_v18 }
 0x13e   :  { %v934_v24 = vadd.f32 %v2074_v22, %v859_v9 }
 0x140   :  { %v1009_v25 = vadd.f32 %v2112_v23, %v934_v24 }
 0x156   :  { %v2145_v26 = vpop.f32.mrb[12].mxu0 }
 0x157   :  { %v2146_v27 = vpop.f32.mrb[13].mxu0 }
 0x158   :  { %v2147_v28 = vadd.f32 %v2146_v27, %v2145_v26 }
 0x15a   :  { %v2148_v29 = vpop.f32.mrb[14].mxu0  ;;  %v1079_v30 = vadd.f32 %v2147_v28, %v1004_v21 }
 0x15b   :  { %v2149_v31 = vpop.f32.mrb[15].mxu0 }
 0x15c   :  { %v2150_v32 = vadd.f32 %v2149_v31, %v2148_v29 }
 0x15e   :  { %v1084_v33 = vadd.f32 %v2150_v32, %v1009_v25 }
 0x163   :  { %v1153_v34 = vpop.f32.mrb[12].mxu1 }
 0x164   :  { %v1154_v35 = vadd.f32 %v1153_v34, %v1079_v30  ;;  %v1155_v36 = vpop.f32.mrb[13].mxu1 }
 0x166   :  { %v1162_v37 = vmax.f32 %v1154_v35, 0.0 }
 0x167   :  { %v1158_v38 = vpop.f32.mrb[14].mxu1 }
 0x168   :  { %v1159_v39 = vadd.f32 %v1158_v38, %v1084_v33  ;;  %v1160_v40 = vpop.f32.mrb[15].mxu1  ;;  %2180 = vmatprep.mubr.msk.f32.mxu0 %vm1180_vm4, %v1162_v37 }
 0x16a   :  { %v1163_v41 = vmax.f32 %v1159_v39, 0.0 }
 0x16c   :  { %2181 = vmatmul.mubr.msk.f32.vlgmr.msra.gmra.mrb[16].mxu0 %vm1180_vm4, %v1163_v41 }
 0x23f   :  { %v2182_v43 = vpop.f32.mrb[16].mxu0 }
 0x240   :  { %v1259_v44 = vadd.f32 %v2182_v43, %v1273_v42  ;;  %v1253_v45 = vpop.f32.mrb[17].mxu0 }
 0x241   :  { %v1254_v46 = vadd.f32 %v1273_v42, %v1253_v45 }
 0x242   :  { %1264 = vst.msk [vmem:[%s3015_s5 + $0x8] sm:$0xff] %vm1262_vm5, %v1259_v44 }
 0x243   :  { %1263 = vst.msk [vmem:[%s3015_s5] sm:$0xff] %vm1262_vm5, %v1254_v46 }

</bundles_post_ra>
